<compile_context>
chip_gen: v7x
topology: tpu7x:2x2x1
jax: 0.10.0
libtpu: 0.0.40
codegen_flags: <defaults>
</compile_context>

<pallas_src>
import functools

import jax
import jax.numpy as jnp
from jax.experimental import pallas as pl
from jax.experimental.pallas import tpu as pltpu

_VMEM_LIMIT = 32 * 1024 * 1024      # safe on v5e/v6e (128 MiB) and v7x (64 MiB)
_BLOCK_BUDGET = 2 * 1024 * 1024     # target bytes per (tn, dt) x-block


def _pick_dt(d):
    """Channel (lane) tile: wide & lane-dense; full-D block when D % 128 != 0."""
    if d % 128 != 0:
        return d                    # block dim == full array dim is allowed
    for cand in (1024, 512, 256, 128):
        if d % cand == 0 and d // cand >= 2:
            return cand             # widest tile that still leaves >=2 D steps (v7x megacore)
    return d


def _pick_tn(n, dt, itemsize):
    """Row (sublane) tile sized against the VMEM block budget, multiple of 8."""
    max_tn = max(8, (_BLOCK_BUDGET // (dt * max(itemsize, 4))) // 8 * 8)
    return min(max_tn, ((n + 7) // 8) * 8)


def _stats_kernel(x_ref, sum_ref, sq_ref, acc_sum, acc_sq, *, n_rows, tn, need_mask):
    k = pl.program_id(1)            # N (reduction) axis, innermost

    @pl.when(k == 0)
    def _():
        acc_sum[...] = jnp.zeros_like(acc_sum)
        acc_sq[...] = jnp.zeros_like(acc_sq)

    x = x_ref[...].astype(jnp.float32)
    if need_mask:                   # only the last N tile can run past N rows
        row = k * tn + jax.lax.broadcasted_iota(jnp.int32, x.shape, 0)
        x = jnp.where(row < n_rows, x, 0.0)

    acc_sum[...] += jnp.sum(x, axis=0, keepdims=True)
    acc_sq[...] += jnp.sum(x * x, axis=0, keepdims=True)

    @pl.when(k == pl.num_programs(1) - 1)
    def _():
        sum_ref[...] = acc_sum[...]
        sq_ref[...] = acc_sq[...]


def _apply_kernel(x_ref, scale_ref, shift_ref, o_ref):
    # Affine + normalization folded into per-channel scale/shift: 2 VPU ops/elem.
    x = x_ref[...].astype(jnp.float32)
    o_ref[...] = (x * scale_ref[...] + shift_ref[...]).astype(o_ref.dtype)


def batchnorm1d_node(x, gamma, beta, *, eps=1e-5):
    """Training-mode BatchNorm1d over node features x: [N, D]; gamma/beta: [D]."""
    n, d = x.shape
    dt = _pick_dt(d)
    tn = _pick_tn(n, dt, x.dtype.itemsize)
    d_grid = d // dt
    n_grid = pl.cdiv(n, tn)

    # ---- pass 1: per-channel sum and sum of squares --------------------------
    stats_kernel = functools.partial(
        _stats_kernel, n_rows=n, tn=tn, need_mask=(n % tn != 0))
    s, sq = pl.pallas_call(
        stats_kernel,
        out_shape=(jax.ShapeDtypeStruct((1, d), jnp.float32),
                   jax.ShapeDtypeStruct((1, d), jnp.float32)),
        grid_spec=pltpu.PrefetchScalarGridSpec(
            num_scalar_prefetch=0,
            grid=(d_grid, n_grid),
            in_specs=[pl.BlockSpec((tn, dt), lambda j, k: (k, j))],
            out_specs=[pl.BlockSpec((1, dt), lambda j, k: (0, j)),
                       pl.BlockSpec((1, dt), lambda j, k: (0, j))],
            scratch_shapes=[pltpu.VMEM((1, dt), jnp.float32),
                            pltpu.VMEM((1, dt), jnp.float32)]),
        compiler_params=pltpu.CompilerParams(
            dimension_semantics=("parallel", "arbitrary"),
            vmem_limit_bytes=_VMEM_LIMIT),
        cost_estimate=pl.CostEstimate(
            flops=3 * n * d, transcendentals=0,
            bytes_accessed=n * d * x.dtype.itemsize + 2 * d * 4),
    )(x)

    # ---- tiny O(D) epilogue: fold stats + affine into scale / shift ----------
    inv_n = 1.0 / n
    mean = s * inv_n
    var = jnp.maximum(sq * inv_n - mean * mean, 0.0)       # biased batch variance
    inv_std = jax.lax.rsqrt(var + eps)
    scale = gamma.astype(jnp.float32).reshape(1, d) * inv_std
    shift = beta.astype(jnp.float32).reshape(1, d) - mean * scale

    # ---- pass 2: y = x * scale + shift ----------------------------------------
    return pl.pallas_call(
        _apply_kernel,
        out_shape=jax.ShapeDtypeStruct((n, d), x.dtype),
        grid_spec=pltpu.PrefetchScalarGridSpec(
            num_scalar_prefetch=0,
            grid=(d_grid, n_grid),
            in_specs=[pl.BlockSpec((tn, dt), lambda j, k: (k, j)),
                      pl.BlockSpec((1, dt), lambda j, k: (0, j)),
                      pl.BlockSpec((1, dt), lambda j, k: (0, j))],
            out_specs=pl.BlockSpec((tn, dt), lambda j, k: (k, j))),
        compiler_params=pltpu.CompilerParams(
            dimension_semantics=("parallel", "parallel"),
            vmem_limit_bytes=_VMEM_LIMIT),
        cost_estimate=pl.CostEstimate(
            flops=2 * n * d, transcendentals=0,
            bytes_accessed=2 * n * d * x.dtype.itemsize + 2 * d * 4),
    )(x, scale, shift)


def _reference_bn(x, gamma, beta, eps=1e-5):
    x32 = x.astype(jnp.float32)
    mean = jnp.mean(x32, axis=0, keepdims=True)
    var = jnp.mean((x32 - mean) ** 2, axis=0, keepdims=True)
    return ((x32 - mean) / jnp.sqrt(var + eps) * gamma + beta).astype(x.dtype)


if __name__ == "__main__":
    # Small shapes consistent with the module: N nodes, dim_in feature channels.
    N, DIM_IN = 8, 32
    kx, kg, kb = jax.random.split(jax.random.PRNGKey(0), 3)
    x = jax.random.normal(kx, (N, DIM_IN), dtype=jnp.float32)
    gamma = 1.0 + 0.1 * jax.random.normal(kg, (DIM_IN,), dtype=jnp.float32)
    beta = 0.1 * jax.random.normal(kb, (DIM_IN,), dtype=jnp.float32)

    out = jax.block_until_ready(batchnorm1d_node(x, gamma, beta, eps=1e-5))
    ref = _reference_bn(x, gamma, beta, eps=1e-5)

    assert out.shape == (N, DIM_IN)
    assert jnp.allclose(out, ref, atol=1e-4, rtol=1e-4), float(
        jnp.max(jnp.abs(out - ref)))

    print("KERNEL_OK")
</pallas_src>

<mosaic_0001>
module attributes {stable_mosaic.version = 11 : i64} {
  func.func @_stats_kernel(%arg0: i32, %arg1: i32, %arg2: memref<8x32xf32, #tpu.memory_space<vmem>>, %arg3: memref<1x32xf32, #tpu.memory_space<vmem>>, %arg4: memref<1x32xf32, #tpu.memory_space<vmem>>, %arg5: memref<1x32xf32, #tpu.memory_space<vmem>>, %arg6: memref<1x32xf32, #tpu.memory_space<vmem>>) attributes {dimension_semantics = [#tpu.dimension_semantics<parallel>, #tpu.dimension_semantics<arbitrary>], iteration_bounds = array<i64: 1, 1>, scalar_prefetch = 0 : i64, scratch_operands = 2 : i64, tpu.core_type = #tpu.core_type<tc>, window_params = [{transform_indices = @transform_0, window_bounds = array<i64: 8, 32>}, {transform_indices = @transform_1, window_bounds = array<i64: 1, 32>}, {transform_indices = @transform_2, window_bounds = array<i64: 1, 32>}]} {
    %c0_i32 = arith.constant 0 : i32
    %0 = arith.cmpi eq, %arg1, %c0_i32 : i32
    %1 = arith.extui %0 : i1 to i32
    %c0_i32_0 = arith.constant 0 : i32
    %2 = arith.cmpi ne, %1, %c0_i32_0 : i32
    scf.if %2 {
      %cst_13 = arith.constant 0.000000e+00 : f32
      %18 = vector.broadcast %cst_13 : f32 to vector<1x32xf32>
      %c0_14 = arith.constant 0 : index
      %c0_15 = arith.constant 0 : index
      %19 = vector.load %arg5[%c0_14, %c0_15] : memref<1x32xf32, #tpu.memory_space<vmem>>, vector<1x32xf32>
      tpu.vector_store %arg5[%c0_14, %c0_15], %18 {strides = array<i32>} : memref<1x32xf32, #tpu.memory_space<vmem>>, vector<1x32xf32>,
      %cst_16 = arith.constant 0.000000e+00 : f32
      %20 = vector.broadcast %cst_16 : f32 to vector<1x32xf32>
      %c0_17 = arith.constant 0 : index
      %c0_18 = arith.constant 0 : index
      %21 = vector.load %arg6[%c0_17, %c0_18] : memref<1x32xf32, #tpu.memory_space<vmem>>, vector<1x32xf32>
      tpu.vector_store %arg6[%c0_17, %c0_18], %20 {strides = array<i32>} : memref<1x32xf32, #tpu.memory_space<vmem>>, vector<1x32xf32>,
    } else {
    }
    %c0 = arith.constant 0 : index
    %c0_1 = arith.constant 0 : index
    %3 = vector.load %arg2[%c0, %c0_1] : memref<8x32xf32, #tpu.memory_space<vmem>>, vector<8x32xf32>
    %c0_2 = arith.constant 0 : index
    %c0_3 = arith.constant 0 : index
    %4 = vector.load %arg5[%c0_2, %c0_3] : memref<1x32xf32, #tpu.memory_space<vmem>>, vector<1x32xf32>
    %cst = arith.constant dense<0.000000e+00> : vector<32xf32>
    %5 = vector.multi_reduction <add>, %3, %cst [0] : vector<8x32xf32> to vector<32xf32>
    %6 = vector.shape_cast %5 : vector<32xf32> to vector<1x32xf32>
    %7 = arith.addf %4, %6 : vector<1x32xf32>
    %c0_4 = arith.constant 0 : index
    %c0_5 = arith.constant 0 : index
    %8 = vector.load %arg5[%c0_4, %c0_5] : memref<1x32xf32, #tpu.memory_space<vmem>>, vector<1x32xf32>
    tpu.vector_store %arg5[%c0_4, %c0_5], %7 {strides = array<i32>} : memref<1x32xf32, #tpu.memory_space<vmem>>, vector<1x32xf32>,
    %c0_6 = arith.constant 0 : index
    %c0_7 = arith.constant 0 : index
    %9 = vector.load %arg6[%c0_6, %c0_7] : memref<1x32xf32, #tpu.memory_space<vmem>>, vector<1x32xf32>
    %10 = arith.mulf %3, %3 : vector<8x32xf32>
    %cst_8 = arith.constant dense<0.000000e+00> : vector<32xf32>
    %11 = vector.multi_reduction <add>, %10, %cst_8 [0] : vector<8x32xf32> to vector<32xf32>
    %12 = vector.shape_cast %11 : vector<32xf32> to vector<1x32xf32>
    %13 = arith.addf %9, %12 : vector<1x32xf32>
    %c0_9 = arith.constant 0 : index
    %c0_10 = arith.constant 0 : index
    %14 = vector.load %arg6[%c0_9, %c0_10] : memref<1x32xf32, #tpu.memory_space<vmem>>, vector<1x32xf32>
    tpu.vector_store %arg6[%c0_9, %c0_10], %13 {strides = array<i32>} : memref<1x32xf32, #tpu.memory_space<vmem>>, vector<1x32xf32>,
    %c0_i32_11 = arith.constant 0 : i32
    %15 = arith.cmpi eq, %arg1, %c0_i32_11 : i32
    %16 = arith.extui %15 : i1 to i32
    %c0_i32_12 = arith.constant 0 : i32
    %17 = arith.cmpi ne, %16, %c0_i32_12 : i32
    scf.if %17 {
      %c0_13 = arith.constant 0 : index
      %c0_14 = arith.constant 0 : index
      %18 = vector.load %arg5[%c0_13, %c0_14] : memref<1x32xf32, #tpu.memory_space<vmem>>, vector<1x32xf32>
      %c0_15 = arith.constant 0 : index
      %c0_16 = arith.constant 0 : index
      %19 = vector.load %arg3[%c0_15, %c0_16] : memref<1x32xf32, #tpu.memory_space<vmem>>, vector<1x32xf32>
      tpu.vector_store %arg3[%c0_15, %c0_16], %18 {strides = array<i32>} : memref<1x32xf32, #tpu.memory_space<vmem>>, vector<1x32xf32>,
      %c0_17 = arith.constant 0 : index
      %c0_18 = arith.constant 0 : index
      %20 = vector.load %arg6[%c0_17, %c0_18] : memref<1x32xf32, #tpu.memory_space<vmem>>, vector<1x32xf32>
      %c0_19 = arith.constant 0 : index
      %c0_20 = arith.constant 0 : index
      %21 = vector.load %arg4[%c0_19, %c0_20] : memref<1x32xf32, #tpu.memory_space<vmem>>, vector<1x32xf32>
      tpu.vector_store %arg4[%c0_19, %c0_20], %20 {strides = array<i32>} : memref<1x32xf32, #tpu.memory_space<vmem>>, vector<1x32xf32>,
    } else {
    }
    return
  }
  func.func @transform_0(%arg0: i32, %arg1: i32) -> (i32, i32) {
    %c0_i32 = arith.constant 0 : i32
    return %arg1, %arg0 : i32, i32
  }
  func.func @transform_1(%arg0: i32, %arg1: i32) -> (i32, i32) {
    %c0_i32 = arith.constant 0 : i32
    %c0_i32_0 = arith.constant 0 : i32
    return %c0_i32, %arg0 : i32, i32
  }
  func.func @transform_2(%arg0: i32, %arg1: i32) -> (i32, i32) {
    %c0_i32 = arith.constant 0 : i32
    %c0_i32_0 = arith.constant 0 : i32
    return %c0_i32, %arg0 : i32, i32
  }
}

</mosaic_0001>

<bundles_post_ra>
// kernel: tpu_custom_call.1
= control target key start
LH: loop header
LB: loop body
LE: loop exit
PB: predicated region body
PF: predicated region fallthrough
CT: control target
= control target key end

     0   :  { %8 = vsyncpa [#allocation5], 0  ;;  %s236_s0 = inlined_call_operand.hbm [shape: f32[8,32], index: 0, kind: input, shape index: {}]   ;;  %s237_s1 = inlined_call_operand.hbm [shape: f32[1,32], index: 1, kind: output, shape index: {0}]   ;;  %s238_s2 = inlined_call_operand.hbm [shape: f32[1,32], index: 2, kind: output, shape index: {1}]  }
   0x1   :  { %9 = vsyncpa [#allocation6], 0 }
   0x2   :  { %10 = vsyncpa [#allocation9], 0  ;;  %s167_s9 = smov [#allocation4]   ;;  %s95_s13 = scalar_lea.hbm %s236_s0, 128 }
   0x3   :  { %s17_s10 = sshll.u32 %s167_s9, 4  ;;  %p96_p0 = scmp.ne.s32.totalorder %s236_s0, %s95_s13  ;;  %s18_s10 = int_to_ptr.vmem [resolvable:$true] %s17_s10 }
   0x4   :  { %p99_p1 = scmp.lt.u32.totalorder %s95_s13, %s236_s0 }
   0x6   :  { %p101_p2 = pnand %p99_p1, %p96_p0 }
   0x8   :  { %104 = shalt.err (!%p101_p2)
}
   0x9   :  { %s105_s18 = scalar_lea.vmem %s18_s10, 128  ;;  %p110_p4 = scmp.lt.s32.totalorder %s18_s10, %s18_s10 }
   0xa   :  { %p106_p3 = scmp.ne.s32.totalorder %s18_s10, %s105_s18  ;;  %p111_p5 = scmp.lt.s32.totalorder %s105_s18, %s105_s18 }
   0xc   :  { %p112_p6 = por %p111_p5, %p110_p4 }
   0xe   :  { %p113_p7 = pnand %p112_p6, %p106_p3 }
  0x10   :  { %116 = shalt.err (!%p113_p7)
}
  0x11   :  { %20 = dma.hbm_to_vmem [thread:$0]  %s236_s0, 128, %s18_s10, [#allocation5]  }
  0x12   :  { %161 = dma.done.wait [#allocation5], 128  }
  0x13   :  { %162 = vsyncadd [#allocation5], 4294967168  ;;  %vm28_vm0 = vcmask 253952   ;;  %v168_v0 = vmov 0.0   ;;  %vm33_vm1 = vcmask 261120   ;;  %v31_v1 = vld [vmem:[#allocation4] sm:$0xff] }
  0x14   :  { %29 = vst.msk [vmem:[#allocation2] sm:$0x1] %vm28_vm0, %v168_v0  ;;  %30 = vst.msk [vmem:[#allocation3] sm:$0x1] %vm28_vm0, %v168_v0  ;;  %v34_v2 = vsel %vm33_vm1, %v31_v1, 0.0  ;;  %v45_v3 = vmul.f32 %v31_v1, %v31_v1  ;;  %s169_s0 = smov [#allocation7]  }
  0x15   :  { %v35_v4 = vrot.slane %v34_v2, 4  ;;  %s68_s21 = sshll.u32 %s169_s0, 4  ;;  %s170_s22 = smov [#allocation8]   ;;  %s69_s21 = int_to_ptr.vmem [resolvable:$true] %s68_s21 }
  0x16   :  { %v46_v5 = vsel %vm33_vm1, %v45_v3, 0.0  ;;  %s78_s23 = sshll.u32 %s170_s22, 4  ;;  %s117_s24 = scalar_lea.vmem %s69_s21, 16  ;;  %s203_s23 = int_to_ptr.vmem [resolvable:$true] %s78_s23 }
  0x17   :  { %v36_v6 = vadd.f32 %v35_v4, %v34_v2  ;;  %v47_v7 = vrot.slane %v46_v5, 4  ;;  %p118_p8 = scmp.ne.s32.totalorder %s69_s21, %s117_s24  ;;  %s121_s25 = scalar_lea.vmem %s69_s21, 32 }
  0x18   :  { %p122_p9 = scmp.lt.s32.totalorder %s69_s21, %s69_s21  ;;  %p123_p10 = scmp.lt.s32.totalorder %s121_s25, %s117_s24 }
  0x19   :  { %v37_v8 = vrot.slane %v36_v6, 2  ;;  %v48_v9 = vadd.f32 %v47_v7, %v46_v5 }
  0x1a   :  { %p124_p11 = por %p123_p10, %p122_p9 }
  0x1b   :  { %v38_v10 = vadd.f32 %v37_v8, %v36_v6  ;;  %v49_v11 = vrot.slane %v48_v9, 2  ;;  %v32_v14 = vld [vmem:[#allocation2] sm:$0x1]  ;;  %v44_v17 = vld [vmem:[#allocation3] sm:$0x1] }
  0x1c   :  { %p125_p12 = pnand %p124_p11, %p118_p8 }
  0x1d   :  { %v39_v12 = vrot.slane %v38_v10, 1  ;;  %v50_v13 = vadd.f32 %v49_v11, %v48_v9 }
  0x1f   :  { %v40_v15 = vadd.f32 %v39_v12, %v38_v10  ;;  %v51_v16 = vrot.slane %v50_v13, 1 }
  0x21   :  { %v41_v18 = vadd.f32 %v40_v15, %v32_v14  ;;  %v52_v19 = vadd.f32 %v51_v16, %v50_v13 }
  0x23   :  { %43 = vst.msk [vmem:[#allocation2] sm:$0x1] %vm28_vm0, %v41_v18  ;;  %v53_v20 = vadd.f32 %v52_v19, %v44_v17 }
  0x25   :  { %54 = vst.msk [vmem:[#allocation3] sm:$0x1] %vm28_vm0, %v53_v20 }
  0x2a   :  { %v58_v21 = vld [vmem:[#allocation2] sm:$0x1] }
  0x2b   :  { %59 = vst.msk [vmem:[#allocation7] sm:$0x1] %vm28_vm0, %v58_v21 }
  0x2c   :  { %v60_v22 = vld [vmem:[#allocation3] sm:$0x1] }
  0x2d   :  { %128 = shalt.err (!%p125_p12)
}
  0x2e   :  { %s129_s28 = scalar_lea.hbm %s237_s1, 16 }
  0x2f   :  { %p130_p13 = scmp.ne.s32.totalorder %s237_s1, %s129_s28  ;;  %p133_p0 = scmp.lt.u32.totalorder %s129_s28, %s237_s1 }
  0x31   :  { %p135_p1 = pnand %p133_p0, %p130_p13 }
  0x33   :  { %138 = shalt.err (!%p135_p1)
}
  0x34   :  { %71 = dma.vmem_to_hbm [thread:$0]  %s69_s21, 16, %s237_s1, [#allocation6]   ;;  %61 = vst.msk [vmem:[#allocation8] sm:$0x1] %vm28_vm0, %v60_v22 }
  0x35   :  { %s139_s7 = scalar_lea.vmem %s203_s23, 16  ;;  %s143_s8 = scalar_lea.vmem %s203_s23, 32 }
  0x36   :  { %p140_p2 = scmp.ne.s32.totalorder %s203_s23, %s139_s7  ;;  %p144_p3 = scmp.lt.s32.totalorder %s203_s23, %s203_s23 }
  0x37   :  { %p145_p4 = scmp.lt.s32.totalorder %s143_s8, %s139_s7 }
  0x39   :  { %p146_p5 = por %p145_p4, %p144_p3 }
  0x3b   :  { %p147_p6 = pnand %p146_p5, %p140_p2 }
  0x3d   :  { %150 = shalt.err (!%p147_p6)
}
  0x3e   :  { %s151_s11 = scalar_lea.hbm %s238_s2, 16 }
  0x3f   :  { %p152_p7 = scmp.ne.s32.totalorder %s238_s2, %s151_s11  ;;  %p155_p8 = scmp.lt.u32.totalorder %s151_s11, %s238_s2 }
  0x41   :  { %p157_p9 = pnand %p155_p8, %p152_p7 }
  0x43   :  { %160 = shalt.err (!%p157_p9)
}
  0x44   :  { %81 = dma.vmem_to_hbm [thread:$0]  %s203_s23, 16, %s238_s2, [#allocation9]  }
  0x45   :  { %163 = dma.done.wait [#allocation6], 16  }
  0x46   :  { %164 = vsyncadd [#allocation6], 4294967280 }
  0x47   :  { %165 = dma.done.wait [#allocation9], 16  }
  0x48   :  { %166 = vsyncadd [#allocation9], 4294967280 }
  0x49   :  { %88 = vsyncpa [#allocation5], 1 }
  0x4a   :  { %89 = vsyncpa [#allocation6], 1 }
  0x4b   :  { %90 = vsyncpa [#allocation9], 1 }

</bundles_post_ra>
